<compile_context>
chip_gen: v5e
topology: v5e:2x2
jax: 0.10.0
libtpu: 0.0.40
codegen_flags: <defaults>
</compile_context>

<pallas_src>
import functools

import jax
import jax.numpy as jnp
from jax.experimental import pallas as pl
from jax.experimental.pallas import tpu as pltpu

LANES = 128       # MXU / vreg lane width
IN_LANES = 32     # input features padded 30 -> 32
OUT_LANES = 8     # stored output lanes (only column 0 is valid)

# bf16 parameter slab layout (rows x 128 lanes):
#   [  0: 32)  W1   valid [30, 64]   (K matches the 32-wide x tile)
#   [ 32:160)  W2   valid [64, 32]
#   [160:288)  W3   valid [32, 32]
#   [288:416)  W45  valid [32,  1]   (fused linear4 @ linear5)
#   row 416    b1   valid cols [0:64)
#   row 424    b2   valid cols [0:32)
#   row 432    b3   valid cols [0:32)
#   row 440    b45  valid col  0
SLAB_ROWS = 448
_W1, _W2, _W3, _W45 = 0, 32, 160, 288
_B1, _B2, _B3, _B45 = 416, 424, 432, 440


def mlp_kernel(x_ref, slab_ref, o_ref):
    x = x_ref[...]                                        # [TILE_B, 32] bf16

    w1 = slab_ref[_W1:_W1 + 32, :]
    w2 = slab_ref[_W2:_W2 + 128, :]
    w3 = slab_ref[_W3:_W3 + 128, :]
    w45 = slab_ref[_W45:_W45 + 128, :]
    b1 = slab_ref[_B1:_B1 + 1, :].astype(jnp.float32)
    b2 = slab_ref[_B2:_B2 + 1, :].astype(jnp.float32)
    b3 = slab_ref[_B3:_B3 + 1, :].astype(jnp.float32)
    b45 = slab_ref[_B45:_B45 + 1, :].astype(jnp.float32)

    # bf16 matmuls, f32 accumulation; activations recast to bf16 between layers.
    h = jnp.dot(x, w1, preferred_element_type=jnp.float32) + b1
    h = jnp.maximum(h, 0.0).astype(jnp.bfloat16)
    h = jnp.dot(h, w2, preferred_element_type=jnp.float32) + b2
    h = jnp.maximum(h, 0.0).astype(jnp.bfloat16)
    h = jnp.dot(h, w3, preferred_element_type=jnp.float32) + b3
    h = jnp.maximum(h, 0.0).astype(jnp.bfloat16)
    # fused linear4 + linear5 (no activation between them in the torch forward)
    h = jnp.dot(h, w45, preferred_element_type=jnp.float32) + b45   # [TILE_B, 128] f32

    z = h[:, :OUT_LANES]                                  # only lane 0 is valid
    sig = pl.reciprocal(1.0 + jnp.exp(-z), approx=True)
    o_ref[...] = sig.astype(o_ref.dtype)


def pack_params(params):
    """Fuse linear4/linear5 and pack everything into one bf16 (448, 128) slab."""
    w1, b1, w2, b2, w3, b3, w4, b4, w5, b5 = params
    w45 = w4 @ w5                 # [32, out]  (fused in f32, then cast to bf16)
    b45 = b4 @ w5 + b5            # [1, out]

    def pad(a, rows):
        return jnp.zeros((rows, LANES), jnp.float32).at[: a.shape[0], : a.shape[1]].set(a)

    slab = jnp.concatenate(
        [
            pad(w1, 32),
            pad(w2, 128),
            pad(w3, 128),
            pad(w45, 128),
            pad(b1.reshape(1, -1), 8),
            pad(b2.reshape(1, -1), 8),
            pad(b3.reshape(1, -1), 8),
            pad(b45.reshape(1, -1), 8),
        ],
        axis=0,
    )
    assert slab.shape == (SLAB_ROWS, LANES)
    return slab.astype(jnp.bfloat16)


def _pick_tile(pb):
    """pb is a multiple of 8.  Returns the batch-tile size (multiple of 8)."""
    if pb <= 512:
        return pb                 # single step; tiny batches don't amortize splitting
    # >= 2 grid steps so v7x's two TensorCores both get work; cap tiles at 2048 rows.
    half = (((pb + 1) // 2) + 7) // 8 * 8
    return max(256, min(2048, half))


@functools.partial(jax.jit, static_argnames=("out_dim",))
def mlp_forward(x, slab, *, out_dim):
    """x: [batch, in_dim] f32, slab: packed bf16 params. Returns [batch, out_dim] f32."""
    batch, in_dim = x.shape
    assert in_dim <= IN_LANES and out_dim <= OUT_LANES

    pb = ((batch + 7) // 8) * 8
    tile_b = _pick_tile(pb)
    pb = ((pb + tile_b - 1) // tile_b) * tile_b

    # features padded only to 32 lanes, streamed in bf16 (f32 accumulation in-kernel)
    x_pad = (
        jnp.zeros((pb, IN_LANES), jnp.bfloat16)
        .at[:batch, :in_dim]
        .set(x.astype(jnp.bfloat16))
    )

    out = pl.pallas_call(
        mlp_kernel,
        out_shape=jax.ShapeDtypeStruct((pb, OUT_LANES), jnp.float32),
        grid=(pb // tile_b,),
        in_specs=[
            pl.BlockSpec((tile_b, IN_LANES), lambda i: (i, 0)),    # activation tile
            pl.BlockSpec((SLAB_ROWS, LANES), lambda i: (0, 0)),    # resident param slab
        ],
        out_specs=pl.BlockSpec((tile_b, OUT_LANES), lambda i: (i, 0)),
        compiler_params=pltpu.CompilerParams(
            dimension_semantics=("parallel",),
        ),
    )(x_pad, slab)

    return out[:batch, :out_dim]


def init_params(key, input_dim, output_dim):
    """Deterministic init mirroring the torch layer shapes.
    Weights are stored as [in, out] (transposed vs torch's [out, in])."""
    dims = [input_dim, 64, 32, 32, 16, output_dim]
    params = []
    for i in range(5):
        key, kw, kb = jax.random.split(key, 3)
        bound = 1.0 / jnp.sqrt(dims[i])
        w = jax.random.uniform(kw, (dims[i], dims[i + 1]), jnp.float32, -bound, bound)
        b = jax.random.uniform(kb, (1, dims[i + 1]), jnp.float32, -bound, bound)
        params += [w, b]
    return tuple(params)


def reference_forward(x, params):
    w1, b1, w2, b2, w3, b3, w4, b4, w5, b5 = params
    h = jnp.maximum(x @ w1 + b1, 0.0)
    h = jnp.maximum(h @ w2 + b2, 0.0)
    h = jnp.maximum(h @ w3 + b3, 0.0)
    h = h @ w4 + b4
    h = h @ w5 + b5
    return jax.nn.sigmoid(h)


if __name__ == "__main__":
    key = jax.random.PRNGKey(0)
    k_x, k_p = jax.random.split(key)

    batch = 8
    input_dim = 30   # breast-cancer dataset has 30 features
    output_dim = 1

    x = jax.random.normal(k_x, (batch, input_dim), jnp.float32)
    params = init_params(k_p, input_dim, output_dim)
    slab = pack_params(params)

    out = mlp_forward(x, slab, out_dim=output_dim)
    out = jax.block_until_ready(out)

    ref = reference_forward(x, params)
    assert out.shape == (batch, output_dim)
    # bf16 weights/activations in the kernel vs the f32 reference -> loose tolerance
    assert jnp.allclose(out, ref, atol=2e-2, rtol=0.0), "mismatch vs JAX reference"

    print("KERNEL_OK")
</pallas_src>

<mosaic_0001>
module attributes {stable_mosaic.version = 11 : i64} {
  func.func @mlp_kernel(%arg0: i32, %arg1: memref<8x32xbf16, #tpu.memory_space<vmem>>, %arg2: memref<448x128xbf16, #tpu.memory_space<vmem>>, %arg3: memref<8x8xf32, #tpu.memory_space<vmem>>) attributes {dimension_semantics = [#tpu.dimension_semantics<parallel>], iteration_bounds = array<i64: 1>, scalar_prefetch = 0 : i64, scratch_operands = 0 : i64, tpu.core_type = #tpu.core_type<tc>, window_params = [{transform_indices = @transform_0, window_bounds = array<i64: 8, 32>}, {pipeline_mode = #tpu.pipeline_mode<synchronous>, transform_indices = @transform_1, window_bounds = array<i64: 448, 128>}, {transform_indices = @transform_2, window_bounds = array<i64: 8, 8>}]} {
    %c0 = arith.constant 0 : index
    %c0_0 = arith.constant 0 : index
    %0 = vector.load %arg1[%c0, %c0_0] : memref<8x32xbf16, #tpu.memory_space<vmem>>, vector<8x32xbf16>
    %c0_1 = arith.constant 0 : index
    %c0_2 = arith.constant 0 : index
    %1 = vector.load %arg2[%c0_1, %c0_2] : memref<448x128xbf16, #tpu.memory_space<vmem>>, vector<32x128xbf16>
    %c32 = arith.constant 32 : index
    %c0_3 = arith.constant 0 : index
    %2 = vector.load %arg2[%c32, %c0_3] : memref<448x128xbf16, #tpu.memory_space<vmem>>, vector<128x128xbf16>
    %c160 = arith.constant 160 : index
    %c0_4 = arith.constant 0 : index
    %3 = vector.load %arg2[%c160, %c0_4] : memref<448x128xbf16, #tpu.memory_space<vmem>>, vector<128x128xbf16>
    %c288 = arith.constant 288 : index
    %c0_5 = arith.constant 0 : index
    %4 = vector.load %arg2[%c288, %c0_5] : memref<448x128xbf16, #tpu.memory_space<vmem>>, vector<128x128xbf16>
    %c416 = arith.constant 416 : index
    %c0_6 = arith.constant 0 : index
    %5 = vector.load %arg2[%c416, %c0_6] : memref<448x128xbf16, #tpu.memory_space<vmem>>, vector<1x128xbf16>
    %6 = arith.extf %5 : vector<1x128xbf16> to vector<1x128xf32>
    %c424 = arith.constant 424 : index
    %c0_7 = arith.constant 0 : index
    %7 = vector.load %arg2[%c424, %c0_7] : memref<448x128xbf16, #tpu.memory_space<vmem>>, vector<1x128xbf16>
    %8 = arith.extf %7 : vector<1x128xbf16> to vector<1x128xf32>
    %c432 = arith.constant 432 : index
    %c0_8 = arith.constant 0 : index
    %9 = vector.load %arg2[%c432, %c0_8] : memref<448x128xbf16, #tpu.memory_space<vmem>>, vector<1x128xbf16>
    %10 = arith.extf %9 : vector<1x128xbf16> to vector<1x128xf32>
    %c440 = arith.constant 440 : index
    %c0_9 = arith.constant 0 : index
    %11 = vector.load %arg2[%c440, %c0_9] : memref<448x128xbf16, #tpu.memory_space<vmem>>, vector<1x128xbf16>
    %12 = arith.extf %11 : vector<1x128xbf16> to vector<1x128xf32>
    %cst = arith.constant dense<0.000000e+00> : vector<8x128xf32>
    %13 = tpu.matmul %0, %1, %cst {dimension_numbers = #tpu.dot_dimension_numbers<[1], [0], [0], [1], [0, 0, 1, 1], [], []>} : vector<8x32xbf16>, vector<32x128xbf16>, vector<8x128xf32> -> vector<8x128xf32>
    %14 = vector.broadcast %6 : vector<1x128xf32> to vector<8x128xf32>
    %15 = arith.addf %13, %14 : vector<8x128xf32>
    %cst_10 = arith.constant 0.000000e+00 : f32
    %16 = vector.broadcast %cst_10 : f32 to vector<8x128xf32>
    %17 = arith.maximumf %15, %16 : vector<8x128xf32>
    %18 = arith.truncf %17 : vector<8x128xf32> to vector<8x128xbf16>
    %cst_11 = arith.constant dense<0.000000e+00> : vector<8x128xf32>
    %19 = tpu.matmul %18, %2, %cst_11 {dimension_numbers = #tpu.dot_dimension_numbers<[1], [0], [0], [1], [0, 0, 1, 1], [], []>} : vector<8x128xbf16>, vector<128x128xbf16>, vector<8x128xf32> -> vector<8x128xf32>
    %20 = vector.broadcast %8 : vector<1x128xf32> to vector<8x128xf32>
    %21 = arith.addf %19, %20 : vector<8x128xf32>
    %cst_12 = arith.constant 0.000000e+00 : f32
    %22 = vector.broadcast %cst_12 : f32 to vector<8x128xf32>
    %23 = arith.maximumf %21, %22 : vector<8x128xf32>
    %24 = arith.truncf %23 : vector<8x128xf32> to vector<8x128xbf16>
    %cst_13 = arith.constant dense<0.000000e+00> : vector<8x128xf32>
    %25 = tpu.matmul %24, %3, %cst_13 {dimension_numbers = #tpu.dot_dimension_numbers<[1], [0], [0], [1], [0, 0, 1, 1], [], []>} : vector<8x128xbf16>, vector<128x128xbf16>, vector<8x128xf32> -> vector<8x128xf32>
    %26 = vector.broadcast %10 : vector<1x128xf32> to vector<8x128xf32>
    %27 = arith.addf %25, %26 : vector<8x128xf32>
    %cst_14 = arith.constant 0.000000e+00 : f32
    %28 = vector.broadcast %cst_14 : f32 to vector<8x128xf32>
    %29 = arith.maximumf %27, %28 : vector<8x128xf32>
    %30 = arith.truncf %29 : vector<8x128xf32> to vector<8x128xbf16>
    %cst_15 = arith.constant dense<0.000000e+00> : vector<8x128xf32>
    %31 = tpu.matmul %30, %4, %cst_15 {dimension_numbers = #tpu.dot_dimension_numbers<[1], [0], [0], [1], [0, 0, 1, 1], [], []>} : vector<8x128xbf16>, vector<128x128xbf16>, vector<8x128xf32> -> vector<8x128xf32>
    %32 = vector.broadcast %12 : vector<1x128xf32> to vector<8x128xf32>
    %33 = arith.addf %31, %32 : vector<8x128xf32>
    %34 = vector.extract_strided_slice %33 {offsets = [0, 0], sizes = [8, 8], strides = [1, 1]} : vector<8x128xf32> to vector<8x8xf32>
    %cst_16 = arith.constant 0.000000e+00 : f32
    %35 = vector.broadcast %cst_16 : f32 to vector<8x8xf32>
    %36 = arith.subf %35, %34 : vector<8x8xf32>
    %37 = math.exp %36 : vector<8x8xf32>
    %cst_17 = arith.constant 1.000000e+00 : f32
    %38 = vector.broadcast %cst_17 : f32 to vector<8x8xf32>
    %39 = arith.addf %38, %37 : vector<8x8xf32>
    %40 = tpu.reciprocal %39 {approx = true} : vector<8x8xf32> -> vector<8x8xf32>
    %c0_18 = arith.constant 0 : index
    %c0_19 = arith.constant 0 : index
    %41 = vector.load %arg3[%c0_18, %c0_19] : memref<8x8xf32, #tpu.memory_space<vmem>>, vector<8x8xf32>
    tpu.vector_store %arg3[%c0_18, %c0_19], %40 {strides = array<i32>} : memref<8x8xf32, #tpu.memory_space<vmem>>, vector<8x8xf32>,
    return
  }
  func.func @transform_0(%arg0: i32) -> (i32, i32) {
    %c0_i32 = arith.constant 0 : i32
    %c0_i32_0 = arith.constant 0 : i32
    return %arg0, %c0_i32 : i32, i32
  }
  func.func @transform_1(%arg0: i32) -> (i32, i32) {
    %c0_i32 = arith.constant 0 : i32
    %c0_i32_0 = arith.constant 0 : i32
    %c0_i32_1 = arith.constant 0 : i32
    return %c0_i32, %c0_i32_0 : i32, i32
  }
  func.func @transform_2(%arg0: i32) -> (i32, i32) {
    %c0_i32 = arith.constant 0 : i32
    %c0_i32_0 = arith.constant 0 : i32
    return %arg0, %c0_i32 : i32, i32
  }
}

</mosaic_0001>

<bundles_post_ra>
// kernel: mlp_forward.1
= control target key start
LH: loop header
LB: loop body
LE: loop exit
PB: predicated region body
PF: predicated region fallthrough
CT: control target
= control target key end

     0   :  { %7 = vsyncpa [#allocation3], 0  ;;  %s487_s12 = smov [#allocation2]   ;;  %s488_s14 = smov 64   ;;  %s514_s0 = inlined_call_operand.vmem [shape: bf16[8,32], index: 0, kind: input, shape index: {}]   ;;  %s515_s1 = inlined_call_operand.hbm [shape: bf16[448,128], index: 1, kind: input, shape index: {}]   ;;  %s516_s2 = inlined_call_operand.vmem [shape: f32[8,8], index: 2, kind: output, shape index: {}]  }
   0x1   :  { %s14_s11 = sshll.u32 %s515_s1, 4  ;;  %s16_s13 = sshll.u32 %s487_s12, 4  ;;  %s15_s11 = int_to_ptr.hbm [resolvable:$true] %s14_s11  ;;  %s17_s13 = int_to_ptr.vmem [resolvable:$true] %s16_s13 }
   0x2   :  { %s489_s15 = smov 4  }
   0x3   :  { %22 = dma.hbm_to_vmem [thread:$0]  %s15_s11, 3584, %s17_s13, [#allocation3], %s488_s14, %s488_s14, %s489_s15  }
   0x4   :  { %485 = dma.done.wait [#allocation3], 3584  }
   0x5   :  { %486 = vsyncadd [#allocation3], 4294963712  ;;  %v429_v0 = vld [vmem:[#allocation2 + $0x8] sm:$0xff]  ;;  %v428_v2 = vld [vmem:[#allocation2] sm:$0xff]  ;;  %vm102_vm0 = vcmask 261120   ;;  %vm316_vm1 = vcmask 64512  }
   0x6   :  { %v437_v1 = vld [vmem:[#allocation2 + $0x48] sm:$0xff]  ;;  %112 = vmatpush.bf16.msra.mxu0 %v429_v0  ;;  %v436_v3 = vld [vmem:[#allocation2 + $0x40] sm:$0xff]  ;;  %v435_v5 = vld [vmem:[#allocation2 + $0x38] sm:$0xff] }
   0x7   :  { %170 = vmatpush.bf16.msra.mxu1 %v437_v1  ;;  %v28_v4 = vld [vmem:[%s514_s0] sm:$0xf]  ;;  %v434_v6 = vld [vmem:[#allocation2 + $0x30] sm:$0xff]  ;;  %v433_v7 = vld [vmem:[#allocation2 + $0x28] sm:$0xff] }
   0x8   :  { %v432_v8 = vld [vmem:[#allocation2 + $0x20] sm:$0xff]  ;;  %v431_v9 = vld [vmem:[#allocation2 + $0x18] sm:$0xff]  ;;  %v430_v10 = vld [vmem:[#allocation2 + $0x10] sm:$0xff] }
   0x9   :  { %v445_v11 = vld [vmem:[#allocation2 + $0x88] sm:$0xff]  ;;  %v444_v12 = vld [vmem:[#allocation2 + $0x80] sm:$0xff]  ;;  %v443_v13 = vld [vmem:[#allocation2 + $0x78] sm:$0xff] }
   0xa   :  { %113 = vmatpush.bf16.msra.mxu0 %v428_v2  ;;  %234 = vmatpush.bf16.msra.mxu2 %v445_v11  ;;  %v442_v14 = vld [vmem:[#allocation2 + $0x70] sm:$0xff]  ;;  %v441_v16 = vld [vmem:[#allocation2 + $0x68] sm:$0xff]  ;;  %v440_v18 = vld [vmem:[#allocation2 + $0x60] sm:$0xff] }
   0xb   :  { %171 = vmatpush.bf16.msra.mxu1 %v436_v3  ;;  %v81_v15 = vld [vmem:[#allocation2 + $0xd0] sm:$0x1]  ;;  %v439_v25 = vld [vmem:[#allocation2 + $0x58] sm:$0xff]  ;;  %v453_v27 = vld [vmem:[#allocation2 + $0xc8] sm:$0xff] }
   0xc   :  { %v82_v17 = vunpack.c.l.bf16 %v81_v15  ;;  %v438_v26 = vld [vmem:[#allocation2 + $0x50] sm:$0xff]  ;;  %298 = vmatpush.bf16.msra.mxu3 %v453_v27  ;;  %v452_v28 = vld [vmem:[#allocation2 + $0xc0] sm:$0xff]  ;;  %v451_v29 = vld [vmem:[#allocation2 + $0xb8] sm:$0xff] }
   0xd   :  { %331 = vmatmul.msk.bf16.vlgmr.msra.gmra.mxu0 %vm102_vm0, %v28_v4  ;;  %v450_v30 = vld [vmem:[#allocation2 + $0xb0] sm:$0xff]  ;;  %v449_v32 = vld [vmem:[#allocation2 + $0xa8] sm:$0xff]  ;;  %v448_v34 = vld [vmem:[#allocation2 + $0xa0] sm:$0xff] }
   0xe   :  { %235 = vmatpush.bf16.msra.mxu2 %v444_v12  ;;  %v89_v19 = vperm.slane %v82_v17, 0  ;;  %v83_v31 = vld [vmem:[#allocation2 + $0xd4] sm:$0x1]  ;;  %v447_v41 = vld [vmem:[#allocation2 + $0x98] sm:$0xff] }
   0xf   :  { %172 = vmatpush.bf16.msra.mxu1 %v435_v5  ;;  %v84_v33 = vunpack.c.l.bf16 %v83_v31  ;;  %v446_v42 = vld [vmem:[#allocation2 + $0x90] sm:$0xff]  ;;  %v85_v43 = vld [vmem:[#allocation2 + $0xd8] sm:$0x1]  ;;  %v87_v51 = vld [vmem:[#allocation2 + $0xdc] sm:$0x1] }
  0x10   :  { %299 = vmatpush.bf16.msra.mxu3 %v452_v28  ;;  %v86_v44 = vunpack.c.l.bf16 %v85_v43  ;;  %v88_v52 = vunpack.c.l.bf16 %v87_v51 }
  0x11   :  { %v121_v35 = vperm.slane %v84_v33, 0 }
  0x12   :  { %236 = vmatpush.bf16.msra.mxu2 %v443_v13  ;;  %v185_v45 = vperm.slane %v86_v44, 0  ;;  %v249_v53 = vperm.slane %v88_v52, 0 }
  0x13   :  { %173 = vmatpush.bf16.msra.mxu1 %v434_v6 }
  0x14   :  { %300 = vmatpush.bf16.msra.mxu3 %v451_v29 }
  0x16   :  { %237 = vmatpush.bf16.msra.mxu2 %v442_v14 }
  0x17   :  { %174 = vmatpush.bf16.msra.mxu1 %v433_v7 }
  0x18   :  { %301 = vmatpush.bf16.msra.mxu3 %v450_v30 }
  0x1a   :  { %238 = vmatpush.bf16.msra.mxu2 %v441_v16 }
  0x1b   :  { %175 = vmatpush.bf16.msra.mxu1 %v432_v8 }
  0x1c   :  { %302 = vmatpush.bf16.msra.mxu3 %v449_v32 }
  0x1e   :  { %239 = vmatpush.bf16.msra.mxu2 %v440_v18 }
  0x1f   :  { %176 = vmatpush.bf16.msra.mxu1 %v431_v9 }
  0x20   :  { %303 = vmatpush.bf16.msra.mxu3 %v448_v34 }
  0x22   :  { %240 = vmatpush.bf16.msra.mxu2 %v439_v25 }
  0x23   :  { %177 = vmatpush.bf16.msra.mxu1 %v430_v10 }
  0x24   :  { %304 = vmatpush.bf16.msra.mxu3 %v447_v41 }
  0x26   :  { %241 = vmatpush.bf16.msra.mxu2 %v438_v26 }
  0x28   :  { %305 = vmatpush.bf16.msra.mxu3 %v446_v42 }
  0x8a   :  { %v115_v20 = vpop.f32.mrf.mxu0 }
  0x8b   :  { %v116_v21 = vadd.f32 %v115_v20, %v89_v19 }
  0x8d   :  { %v119_v22 = vmax.f32 %v116_v21, 0.0 }
  0x8f   :  { %v120_v23 = vpack.c.bf16 %v119_v22, %v119_v22 }
  0x91   :  { %178 = vmatmul.bf16.vlgmr.msra.gmra.mxu1 %v120_v23 }
  0x92   :  { %v117_v24 = vpop.f32.mrf.mxu0 }
 0x10e   :  { %v179_v36 = vpop.f32.mrf.mxu1 }
 0x10f   :  { %v180_v37 = vadd.f32 %v179_v36, %v121_v35 }
 0x111   :  { %v183_v38 = vmax.f32 %v180_v37, 0.0 }
 0x113   :  { %v184_v39 = vpack.c.bf16 %v183_v38, %v183_v38 }
 0x115   :  { %242 = vmatmul.bf16.vlgmr.msra.gmra.mxu2 %v184_v39 }
 0x116   :  { %v181_v40 = vpop.f32.mrf.mxu1 }
 0x198   :  { %v243_v46 = vpop.f32.mrf.mxu2 }
 0x199   :  { %v244_v47 = vadd.f32 %v243_v46, %v185_v45 }
 0x19b   :  { %v247_v48 = vmax.f32 %v244_v47, 0.0 }
 0x19d   :  { %v248_v49 = vpack.c.bf16 %v247_v48, %v247_v48 }
 0x19f   :  { %306 = vmatmul.bf16.vlgmr.msra.gmra.mxu3 %v248_v49 }
 0x1a0   :  { %v245_v50 = vpop.f32.mrf.mxu2 }
 0x222   :  { %v307_v54 = vpop.f32.mrf.mxu3 }
 0x223   :  { %v308_v55 = vadd.f32 %v307_v54, %v249_v53 }
 0x225   :  { %v311_v56 = vsub.f32 0.0, %v308_v55 }
 0x227   :  { %v312_v57 = vmul.f32 1.442695, %v311_v56 }
 0x229   :  { %457 = vpow2.f32 %v312_v57 }
 0x22a   :  { %v309_v58 = vpop.f32.mrf.mxu3 }
 0x22f   :  { %v458_v59 = vpop.eup %457 }
 0x230   :  { %v314_v60 = vadd.f32 1.0, %v458_v59 }
 0x232   :  { %459 = vrcp.f32 %v314_v60 }
 0x238   :  { %v460_v61 = vpop.eup %459 }
 0x239   :  { %317 = vst.msk [vmem:[%s516_s2] sm:$0xff] %vm316_vm1, %v460_v61 }
 0x23a   :  { %322 = vsyncpa [#allocation3], 1 }

</bundles_post_ra>
